<compile_context>
chip_gen: v6e
topology: v6e:2x2x1
jax: 0.10.0
libtpu: 0.0.40
codegen_flags: <defaults>
</compile_context>

<pallas_src>
import math

import jax
import jax.numpy as jnp
from jax import lax
from jax.experimental import pallas as pl
from jax.experimental.pallas import tpu as pltpu


def _round_up(x, m):
    return ((x + m - 1) // m) * m


def _trilinear_kernel(w_ref, x_ref, y_ref, o_ref):
    # w_ref: (3, D)        -- rows [w1; w2; w12]
    # x_ref: (1, TM, D)    -- tile of tensor_1
    # y_ref: (1, TN, D)    -- tile of tensor_2
    # o_ref: (1, TM, TN)
    x = x_ref[0]                                   # (TM, D)
    y = y_ref[0]                                   # (TN, D)
    w1 = w_ref[0:1, :]                             # (1, D)
    w2 = w_ref[1:2, :].astype(x.dtype)             # (1, D)
    w12 = w_ref[2:3, :].astype(x.dtype)            # (1, D)

    # s1 = x @ w1 as (TM, 1), accumulated in f32 (lane reduce; broadcasts
    # along lanes for free in the epilogue add).
    s1 = jnp.sum(x.astype(jnp.float32) * w1.astype(jnp.float32),
                 axis=-1, keepdims=True)           # (TM, 1) f32

    # Fold the w2 term into the MXU matmul:
    #   (x*w12 + w2) @ y^T = (x*w12) @ y^T + broadcast(w2 @ y^T)
    # Contract last dims of both operands -> no transpose of y.
    xw = x * w12 + w2                              # (TM, D), VPU fma
    comb = lax.dot_general(
        xw, y,
        dimension_numbers=(((1,), (1,)), ((), ())),
        preferred_element_type=jnp.float32,
    )                                              # (TM, TN) f32

    o_ref[0] = (comb + s1).astype(o_ref.dtype)


def trilinear_similarity(tensor_1, tensor_2, weight_vector,
                         *, block_m=256, block_n=256):
    """tensor_1: (B, L1, D), tensor_2: (B, L2, D), weight_vector: (3*D,)."""
    B, L1, D = tensor_1.shape
    B2, L2, D2 = tensor_2.shape
    assert B2 == B and D2 == D
    assert weight_vector.shape == (3 * D,)

    w = weight_vector.reshape(3, D)

    # Tile sizes: TM multiple of 8 (sublanes), TN multiple of 128 (lane-dense
    # output stores). 256-wide N fills the 2x256^2 MXU on v6e/v7x and is a
    # clean multiple of the 4x128^2 MXU on v5e.
    tm = min(block_m, _round_up(L1, 8))
    tn = min(block_n, _round_up(L2, 128))

    l1p = _round_up(L1, tm)
    l2p = _round_up(L2, tn)

    x = tensor_1 if l1p == L1 else jnp.pad(
        tensor_1, ((0, 0), (0, l1p - L1), (0, 0)))
    y = tensor_2 if l2p == L2 else jnp.pad(
        tensor_2, ((0, 0), (0, l2p - L2), (0, 0)))

    grid = (B, l1p // tm, l2p // tn)

    # Scoped-VMEM budget from the double-buffered tile footprint, capped at
    # 64 MiB so it is also valid on v7x (64 MiB physical per TC).
    dt_bytes = jnp.dtype(tensor_1.dtype).itemsize
    working = 2 * dt_bytes * (tm * D + tn * D + tm * tn) + 2 * 4 * 3 * D
    vmem_limit = int(min(max(2 * working + (4 << 20), 32 << 20), 64 << 20))

    out = pl.pallas_call(
        _trilinear_kernel,
        out_shape=jax.ShapeDtypeStruct((B, l1p, l2p), tensor_1.dtype),
        grid_spec=pltpu.PrefetchScalarGridSpec(
            num_scalar_prefetch=0,
            grid=grid,
            in_specs=[
                pl.BlockSpec((3, D), lambda b, i, j: (0, 0)),        # weights
                pl.BlockSpec((1, tm, D), lambda b, i, j: (b, i, 0)),  # x tile
                pl.BlockSpec((1, tn, D), lambda b, i, j: (b, j, 0)),  # y tile
            ],
            out_specs=pl.BlockSpec((1, tm, tn), lambda b, i, j: (b, i, j)),
        ),
        compiler_params=pltpu.CompilerParams(
            dimension_semantics=("parallel", "parallel", "parallel"),
            vmem_limit_bytes=vmem_limit,
        ),
    )(w, x, y)

    if l1p != L1 or l2p != L2:
        out = out[:, :L1, :L2]
    return out


def reference(tensor_1, tensor_2, weight_vector):
    D = tensor_1.shape[-1]
    w1, w2, w12 = (weight_vector[:D], weight_vector[D:2 * D],
                   weight_vector[2 * D:])
    s1 = jnp.einsum("bld,d->bl", tensor_1, w1)
    s2 = jnp.einsum("bld,d->bl", tensor_2, w2)
    comb = jnp.einsum("bid,bjd->bij", tensor_1 * w12, tensor_2)
    return comb + s1[:, :, None] + s2[:, None, :]


def _run_case(key, B, L1, L2, D):
    k_w, k_x, k_y = jax.random.split(key, 3)
    # Mirror reset_parameters(): uniform(-std, std), std = sqrt(6/(3*D+1)).
    std = math.sqrt(6.0 / (3 * D + 1))
    weight_vector = jax.random.uniform(
        k_w, (3 * D,), dtype=jnp.float32, minval=-std, maxval=std)
    tensor_1 = jax.random.normal(k_x, (B, L1, D), dtype=jnp.float32)
    tensor_2 = jax.random.normal(k_y, (B, L2, D), dtype=jnp.float32)

    out = trilinear_similarity(tensor_1, tensor_2, weight_vector)
    out = jax.block_until_ready(out)

    ref = reference(tensor_1, tensor_2, weight_vector)
    assert out.shape == (B, L1, L2)
    assert jnp.allclose(out, ref, atol=1e-4, rtol=1e-4)


if __name__ == "__main__":
    key = jax.random.PRNGKey(0)
    k0, k1 = jax.random.split(key)

    # Small aligned-ish case matching the module's natural usage.
    _run_case(k0, B=2, L1=8, L2=8, D=32)
    # Unaligned case to exercise the L1/L2 padding + crop path.
    _run_case(k1, B=2, L1=24, L2=40, D=48)

    print("KERNEL_OK")
</pallas_src>

<mosaic_0001>
module attributes {stable_mosaic.version = 11 : i64} {
  func.func @_trilinear_kernel(%arg0: i32, %arg1: i32, %arg2: i32, %arg3: memref<3x32xf32, #tpu.memory_space<vmem>>, %arg4: memref<1x8x32xf32, #tpu.memory_space<vmem>>, %arg5: memref<1x128x32xf32, #tpu.memory_space<vmem>>, %arg6: memref<1x8x128xf32, #tpu.memory_space<vmem>>) attributes {dimension_semantics = [#tpu.dimension_semantics<parallel>, #tpu.dimension_semantics<parallel>, #tpu.dimension_semantics<parallel>], iteration_bounds = array<i64: 2, 1, 1>, scalar_prefetch = 0 : i64, scratch_operands = 0 : i64, tpu.core_type = #tpu.core_type<tc>, window_params = [{pipeline_mode = #tpu.pipeline_mode<synchronous>, transform_indices = @transform_0, window_bounds = array<i64: 3, 32>}, {transform_indices = @transform_1, window_bounds = array<i64: 1, 8, 32>}, {transform_indices = @transform_2, window_bounds = array<i64: 1, 128, 32>}, {transform_indices = @transform_3, window_bounds = array<i64: 1, 8, 128>}]} {
    %c0 = arith.constant 0 : index
    %c0_0 = arith.constant 0 : index
    %c0_1 = arith.constant 0 : index
    %0 = vector.load %arg4[%c0, %c0_0, %c0_1] : memref<1x8x32xf32, #tpu.memory_space<vmem>>, vector<1x8x32xf32>
    %1 = vector.shape_cast %0 : vector<1x8x32xf32> to vector<8x32xf32>
    %c0_2 = arith.constant 0 : index
    %c0_3 = arith.constant 0 : index
    %c0_4 = arith.constant 0 : index
    %2 = vector.load %arg5[%c0_2, %c0_3, %c0_4] : memref<1x128x32xf32, #tpu.memory_space<vmem>>, vector<1x128x32xf32>
    %3 = vector.shape_cast %2 : vector<1x128x32xf32> to vector<128x32xf32>
    %c0_5 = arith.constant 0 : index
    %c0_6 = arith.constant 0 : index
    %4 = vector.load %arg3[%c0_5, %c0_6] : memref<3x32xf32, #tpu.memory_space<vmem>>, vector<1x32xf32>
    %c1 = arith.constant 1 : index
    %c0_7 = arith.constant 0 : index
    %5 = vector.load %arg3[%c1, %c0_7] : memref<3x32xf32, #tpu.memory_space<vmem>>, vector<1x32xf32>
    %c2 = arith.constant 2 : index
    %c0_8 = arith.constant 0 : index
    %6 = vector.load %arg3[%c2, %c0_8] : memref<3x32xf32, #tpu.memory_space<vmem>>, vector<1x32xf32>
    %7 = vector.broadcast %4 : vector<1x32xf32> to vector<8x32xf32>
    %8 = arith.mulf %1, %7 : vector<8x32xf32>
    %cst = arith.constant dense<0.000000e+00> : vector<8xf32>
    %9 = vector.multi_reduction <add>, %8, %cst [1] : vector<8x32xf32> to vector<8xf32>
    %10 = vector.shape_cast %9 : vector<8xf32> to vector<8x1xf32>
    %11 = vector.broadcast %6 : vector<1x32xf32> to vector<8x32xf32>
    %12 = arith.mulf %1, %11 : vector<8x32xf32>
    %13 = vector.broadcast %5 : vector<1x32xf32> to vector<8x32xf32>
    %14 = arith.addf %12, %13 : vector<8x32xf32>
    %cst_9 = arith.constant dense<0.000000e+00> : vector<8x128xf32>
    %15 = tpu.matmul %14, %3, %cst_9 {dimension_numbers = #tpu.dot_dimension_numbers<[1], [1], [0], [0], [0, 0, 1, 0], [], []>} : vector<8x32xf32>, vector<128x32xf32>, vector<8x128xf32> -> vector<8x128xf32>
    %16 = vector.broadcast %10 : vector<8x1xf32> to vector<8x128xf32>
    %17 = arith.addf %15, %16 : vector<8x128xf32>
    %c0_10 = arith.constant 0 : index
    %c0_11 = arith.constant 0 : index
    %c0_12 = arith.constant 0 : index
    %18 = vector.load %arg6[%c0_10, %c0_11, %c0_12] : memref<1x8x128xf32, #tpu.memory_space<vmem>>, vector<1x8x128xf32>
    %19 = vector.shape_cast %18 : vector<1x8x128xf32> to vector<8x128xf32>
    %20 = vector.shape_cast %17 : vector<8x128xf32> to vector<1x8x128xf32>
    tpu.vector_store %arg6[%c0_10, %c0_11, %c0_12], %20 {strides = array<i32>} : memref<1x8x128xf32, #tpu.memory_space<vmem>>, vector<1x8x128xf32>,
    return
  }
  func.func @transform_0(%arg0: i32, %arg1: i32, %arg2: i32) -> (i32, i32) {
    %c0_i32 = arith.constant 0 : i32
    %c0_i32_0 = arith.constant 0 : i32
    %c0_i32_1 = arith.constant 0 : i32
    return %c0_i32, %c0_i32_0 : i32, i32
  }
  func.func @transform_1(%arg0: i32, %arg1: i32, %arg2: i32) -> (i32, i32, i32) {
    %c0_i32 = arith.constant 0 : i32
    %c0_i32_0 = arith.constant 0 : i32
    return %arg0, %arg1, %c0_i32 : i32, i32, i32
  }
  func.func @transform_2(%arg0: i32, %arg1: i32, %arg2: i32) -> (i32, i32, i32) {
    %c0_i32 = arith.constant 0 : i32
    %c0_i32_0 = arith.constant 0 : i32
    return %arg0, %arg2, %c0_i32 : i32, i32, i32
  }
  func.func @transform_3(%arg0: i32, %arg1: i32, %arg2: i32) -> (i32, i32, i32) {
    %c0_i32 = arith.constant 0 : i32
    return %arg0, %arg1, %arg2 : i32, i32, i32
  }
}

</mosaic_0001>

<bundles_post_ra>
// kernel: tpu_custom_call.1
= control target key start
LH: loop header
LB: loop body
LE: loop exit
PB: predicated region body
PF: predicated region fallthrough
CT: control target
= control target key end

     0   :  { %8 = vsyncpa [#allocation3], 0  ;;  %s903_s0 = inlined_call_operand.vmem [shape: f32[3,32], index: 0, kind: input, shape index: {}]   ;;  %s904_s1 = inlined_call_operand.vmem [shape: f32[2,8,32], index: 1, kind: input, shape index: {}]   ;;  %s905_s2 = inlined_call_operand.vmem [shape: f32[2,128,32], index: 2, kind: input, shape index: {}]   ;;  %s906_s3 = inlined_call_operand.hbm [shape: f32[2,8,128], index: 3, kind: output, shape index: {}]  }
   0x1   :  { %10 = vsyncpa [#allocation3 + $0x1], 0  ;;  %s750_s12 = smov 0   ;;  %s752_s13 = smov 0  }
   0x2   :  { %s754_s14 = smov 0   ;;  %s756_s15 = smov 0  }
   0x3   :  { %s758_s16 = smov 0   ;;  %s760_s17 = smov 0  }
   0x4 LB: > { %s506_s18 = sadd.s32 4294967295, %s725_s17   ;;  %s507_s19 = sadd.s32 4294967294, %s725_s17   ;;  %s725_s17 = sphi %s760_s17, %s16_s17   ;;  %s721_s16 = sphi %s758_s16, %s913_s16   ;;  %s717_s15 = sphi %s756_s15, %s912_s15   ;;  %s713_s14 = sphi %s754_s14, %s911_s14   ;;  %s709_s13 = sphi %s752_s13, %s910_s13   ;;  %s705_s12 = sphi %s750_s12, %s909_s12  }
   0x5   : > { %s35_s20 = sadd.s32 1, %s721_s16  ;;  %s123_s21 = sadd.s32 1, %s713_s14 }
   0x6   : > { %p37_p0 = scmp.ge.s32.totalorder %s35_s20, 2  ;;  %p133_p1 = scmp.ne.s32.totalorder %s713_s14, %s709_s13 }
   0x7   : > { %p134_p2 = scmp.eq.s32.totalorder %s506_s18, 1  ;;  %p139_p3 = scmp.ne.s32.totalorder %s709_s13, %s705_s12 }
   0x8   : > { %s915_s20 = smov (%p37_p0, %s35_s20), 0  ;;  %p140_p5 = scmp.eq.s32.totalorder %s507_s19, 1 }
   0x9   : > { %p790_p4 = por %p134_p2, %p133_p1  ;;  %s116_s23 = ssub.s32 %s721_s16, %s915_s20 }
   0xa   : > { %p510_p6 = scmp.ge.s32.totalorder %s725_s17, 1  ;;  %p121_p7 = scmp.eq.s32.totalorder %s116_s23, 0 }
   0xb   : > { %p797_p8 = por %p140_p5, %p139_p3  ;;  %p184_p9 = scmp.lt.s32.totalorder %s725_s17, 3 }
   0xc   : > { %s803_s25 = scalar_select %p121_p7, %s713_s14, %s123_s21  }
   0xd   : > { %p185_p10 = pnand %p510_p6, %p184_p9 }
   0xe   : > { %p219_p11 = scmp.lt.s32.totalorder (!%p185_p10), %s717_s15, 1  ;;  %s216_s21 = sand.u32 (!%p185_p10), 1, %s709_s13  }
   0xf   : > { %188 = sbr.rel (%p185_p10) target bundleno = 296 (0x128), region = 32  ;;  %s511_s23 = sshll.u32 (!%p185_p10), %s216_s21, 3 }
  0x14   : > { %v727_v0 = vmov 0.0   ;;  %vm728_vm0 = vmmov 0   ;;  %s220_s26 = scalar_select %p219_p11, %s717_s15, 1  ;;  %vm261_vm1 = vcmask 261120   ;;  %v515_v3 = vld [vmem:[%s903_s0] ss:$0 sm:$0xff] }
  0x15   : > { %557 = vmatprep.subr.mxu0 %v727_v0  ;;  %589 = vmatprep.mubr.msk.f32.mxu0 %vm728_vm0, %v727_v0  ;;  %v516_v19 = vld [vmem:[%s903_s0 + $0x2] ss:$0 sm:$0xff]  ;;  %v517_v22 = vld [vmem:[%s903_s0 + $0x1] ss:$0 sm:$0xff] }
  0x16   : > { %s539_s27 = sshll.u32 %s220_s26, 7  ;;  %s512_s4 = sshll.u32 %s220_s26, 3 }
  0x17   : > { %s810_s30 = scalar_lea.vmem %s905_s2, %s539_s27  ;;  %s225_s7 = scalar_lea.vmem %s904_s1, %s512_s4 }
  0x18   : > { %v252_v1 = vld [vmem:[%s810_s30 + $0x78] sm:$0xff]  ;;  %v251_v2 = vld [vmem:[%s810_s30 + $0x70] sm:$0xff]  ;;  %v236_v4 = vld [vmem:[%s225_s7] sm:$0xff]  ;;  %s536_s26 = sshll.u32 %s717_s15, 7  ;;  %s218_s27 = scalar_lea.vmem [#allocation2], %s511_s23 }
  0x19   : > { %558 = vmatpush3.xpose.msk.msra.mxu0 %vm261_vm1, %v252_v1  ;;  %v250_v5 = vld [vmem:[%s810_s30 + $0x68] sm:$0xff]  ;;  %v260_v6 = vmul.f32 %v515_v3, %v236_v4  ;;  %v249_v8 = vld [vmem:[%s810_s30 + $0x60] sm:$0xff]  ;;  %v248_v9 = vld [vmem:[%s810_s30 + $0x58] sm:$0xff]  ;;  %v269_v21 = vmul.f32 %v516_v19, %v236_v4  ;;  %s413_s28 = sshll.u32 %s218_s27, 4  ;;  %s863_s5 = scalar_lea.hbm %s906_s3, %s536_s26  ;;  %s414_s28 = int_to_ptr.vmem [resolvable:$true] %s413_s28 }
  0x1a   : > { %559 = vmatprep.subr.mxu0 %v727_v0  ;;  %v247_v10 = vld [vmem:[%s810_s30 + $0x50] sm:$0xff]  ;;  %v246_v11 = vld [vmem:[%s810_s30 + $0x48] sm:$0xff]  ;;  %v245_v12 = vld [vmem:[%s810_s30 + $0x40] sm:$0xff]  ;;  %s649_s6 = scalar_lea.vmem %s414_s28, 128  ;;  %s729_s7 = smov [#allocation2]  }
  0x1b   : > { %v262_v7 = vsel %vm261_vm1, %v260_v6, 0.0  ;;  %v244_v13 = vld [vmem:[%s810_s30 + $0x38] sm:$0xff]  ;;  %v243_v14 = vld [vmem:[%s810_s30 + $0x30] sm:$0xff]  ;;  %v242_v15 = vld [vmem:[%s810_s30 + $0x28] sm:$0xff]  ;;  %v274_v24 = vadd.f32 %v517_v22, %v269_v21  ;;  %p650_p12 = scmp.ne.s32.totalorder %s414_s28, %s649_s6  ;;  %s653_s15 = sshll.u32 %s729_s7, 4  ;;  %s654_s15 = int_to_ptr.vmem [resolvable:$false] %s653_s15 }
  0x1c   : > { %263 = vadd.xlane.f32.xlu0 %v262_v7  ;;  %v241_v16 = vld [vmem:[%s810_s30 + $0x20] sm:$0xff]  ;;  %v240_v17 = vld [vmem:[%s810_s30 + $0x18] sm:$0xff]  ;;  %v239_v18 = vld [vmem:[%s810_s30 + $0x10] sm:$0xff]  ;;  %s655_s8 = scalar_lea.vmem %s654_s15, 256  ;;  %p656_p1 = scmp.lt.s32.totalorder %s414_s28, %s654_s15 }
  0x1d   : > { %560 = vmatpush3.xpose.msk.msra.mxu0 %vm261_vm1, %v251_v2  ;;  %v238_v20 = vld [vmem:[%s810_s30 + $0x8] sm:$0xff]  ;;  %v237_v23 = vld [vmem:[%s810_s30] sm:$0xff]  ;;  %s398_s30 = scalar_lea.sflag [#allocation3], %s216_s21  ;;  %p651_p13 = pnand %p650_p12, %p790_p4 }
  0x1e   : > { %561 = vmatprep.subr.mxu0 %v727_v0  ;;  %p657_p2 = scmp.lt.s32.totalorder %s655_s8, %s649_s6 }
  0x1f   : > { %p652_p0 = pneg %p651_p13 }
  0x20   : > { %p658_p3 = por %p657_p2, %p656_p1 }
  0x21   : > { %562 = vmatpush3.xpose.msk.msra.mxu0 %vm261_vm1, %v250_v5 }
  0x22   : > { %563 = vmatprep.subr.mxu0 %v727_v0  ;;  %p659_p5 = pnand %p658_p3, %p652_p0 }
  0x25   : > { %564 = vmatpush3.xpose.msk.msra.mxu0 %vm261_vm1, %v249_v8 }
  0x26   : > { %565 = vmatprep.subr.mxu0 %v727_v0 }
  0x29   : > { %566 = vmatpush3.xpose.msk.msra.mxu0 %vm261_vm1, %v248_v9 }
  0x2a   : > { %567 = vmatprep.subr.mxu0 %v727_v0 }
  0x2d   : > { %568 = vmatpush3.xpose.msk.msra.mxu0 %vm261_vm1, %v247_v10 }
  0x2e   : > { %569 = vmatprep.subr.mxu0 %v727_v0 }
  0x31   : > { %570 = vmatpush3.xpose.msk.msra.mxu0 %vm261_vm1, %v246_v11 }
  0x32   : > { %571 = vmatprep.subr.mxu0 %v727_v0 }
  0x35   : > { %572 = vmatpush3.xpose.msk.msra.mxu0 %vm261_vm1, %v245_v12 }
  0x36   : > { %573 = vmatprep.subr.mxu0 %v727_v0 }
  0x39   : > { %574 = vmatpush3.xpose.msk.msra.mxu0 %vm261_vm1, %v244_v13 }
  0x3a   : > { %575 = vmatprep.subr.mxu0 %v727_v0 }
  0x3d   : > { %576 = vmatpush3.xpose.msk.msra.mxu0 %vm261_vm1, %v243_v14 }
  0x3e   : > { %577 = vmatprep.subr.mxu0 %v727_v0 }
  0x41   : > { %578 = vmatpush3.xpose.msk.msra.mxu0 %vm261_vm1, %v242_v15 }
  0x42   : > { %579 = vmatprep.subr.mxu0 %v727_v0 }
  0x45   : > { %580 = vmatpush3.xpose.msk.msra.mxu0 %vm261_vm1, %v241_v16 }
  0x46   : > { %581 = vmatprep.subr.mxu0 %v727_v0 }
  0x49   : > { %582 = vmatpush3.xpose.msk.msra.mxu0 %vm261_vm1, %v240_v17 }
  0x4a   : > { %583 = vmatprep.subr.mxu0 %v727_v0 }
  0x4d   : > { %584 = vmatpush3.xpose.msk.msra.mxu0 %vm261_vm1, %v239_v18 }
  0x4e   : > { %585 = vmatprep.subr.mxu0 %v727_v0 }
  0x51   : > { %586 = vmatpush3.xpose.msk.msra.mxu0 %vm261_vm1, %v238_v20 }
  0x52   : > { %587 = vmatprep.subr.mxu0 %v727_v0 }
  0x55   : > { %588 = vmatpush3.xpose.msk.msra.mxu0 %vm261_vm1, %v237_v23 }
  0x58   : > { %590 = vmatmul.mubr.msk.f32.vlgmr.msra.gmra.mxu0 %vm261_vm1, %v274_v24 }
  0xa5   : > { %v264_v25 = vpop.xlane.xlu0 %263 }
 0x118   : > { %v392_v26 = vpop.f32.mrf.mxu0 }
 0x119   : > { %v393_v27 = vadd.f32 %v392_v26, %v264_v25 }
 0x11a   : > { %v591_v28 = vpop.f32.mrf.mxu0 }
 0x11b   : > { %396 = vst [vmem:[%s218_s27] sm:$0xff] %v393_v27 }
 0x11c   : > { %662 = shalt.err (!%p659_p5)
}
 0x11d   : > { %s663_s9 = scalar_lea.hbm %s863_s5, 128  ;;  %s667_s18 = scalar_lea.hbm %s906_s3, 256 }
 0x11e   : > { %p664_p6 = scmp.ne.s32.totalorder %s863_s5, %s663_s9  ;;  %p668_p10 = scmp.lt.s32.totalorder %s863_s5, %s906_s3 }
 0x11f   : > { %p669_p11 = scmp.lt.s32.totalorder %s667_s18, %s663_s9 }
 0x120   : > { %p665_p7 = pnand %p664_p6, %p790_p4 }
 0x121   : > { %p670_p12 = por %p669_p11, %p668_p10 }
 0x122   : > { %p666_p9 = pneg %p665_p7 }
 0x124   : > { %p671_p13 = pnand %p670_p12, %p666_p9 }
 0x126   : > { %674 = shalt.err (!%p671_p13)
}
 0x127   : > { %592 = dma.vmem_to_hbm [thread:$0]  (%p790_p4), %s414_s28, 128, %s863_s5, %s398_s30  }
 0x128 PF: > { %p598_p0 = scmp.ge.s32.totalorder %s725_s17, 2  ;;  %s425_s23 = sand.u32 1, %s705_s12  }
 0x129   : > { %s426_s26 = scalar_lea.sflag [#allocation3], %s425_s23 }
 0x12a   : > { %p595_p1 = pnand %p598_p0, %p797_p8 }
 0x12c   : > { %p596_p2 = pneg %p595_p1 }
 0x12e   : > { %700 = dma.done.wait (%p596_p2), %s426_s26, 128  }
 0x12f   : > { %702 = vsyncadd (%p596_p2), %s426_s26, 4294967168  ;;  %s16_s17 = sadd.s32 1, %s725_s17   ;;  %s909_s12 = smov %s709_s13 }
 0x130   : > { %p13_p3 = scmp.ge.s32.totalorder %s16_s17, 4   ;;  %s910_s13 = smov %s713_s14 }
 0x131   : > { %s911_s14 = smov %s803_s25  ;;  %s912_s15 = smov %s721_s16 }
 0x132   : > { %s913_s16 = smov %s915_s20  ;;  %15 = sbr.rel (!%p13_p3) target bundleno = 4 (0x4), region = 70 }
 0x137   :  { %431 = vsyncpa [#allocation3], 1 }
 0x138   :  { %433 = vsyncpa [#allocation3 + $0x1], 1 }

</bundles_post_ra>
